<compile_context>
chip_gen: v7x
topology: tpu7x:2x2x1
jax: 0.10.0
libtpu: 0.0.40
codegen_flags: <defaults>
</compile_context>

<pallas_src>
import jax
import jax.numpy as jnp
from jax.experimental import pallas as pl
from jax.experimental.pallas import tpu as pltpu


def _quartic_kernel(x_ref, o_ref):
    x = x_ref[...]
    x2 = x * x
    o_ref[...] = x2 * x2  # x ** 4


# Whole-array-in-VMEM cutoff: in+out ~ 2 * _SMALL_BYTES, far under every
# generation's scoped-VMEM default.
_SMALL_BYTES = 2 * 1024 * 1024


def _pick_block_bytes():
    """Per-generation block size for the streaming path.

    v7x (64 MiB VMEM per TC, ~3.2 TB/s HBM): 8 MiB blocks so the ~0.35 us
    per-step overhead stays small relative to DMA time.  v5e/v6e: 4 MiB.
    """
    try:
        info = pltpu.get_tpu_info()
        vmem = getattr(info, "vmem_capacity_bytes", None)
        if vmem is not None and vmem <= 64 * 1024 * 1024:
            return 8 * 1024 * 1024  # v7x-class part
    except Exception:
        pass
    return 4 * 1024 * 1024


def _cost(n, itemsize):
    # 2 multiplies / element, read + write of the whole array, no transcendentals.
    return pl.CostEstimate(
        flops=2 * n, transcendentals=0, bytes_accessed=2 * n * itemsize
    )


def _quartic_2d(x2d, dtype, itemsize):
    """x**4 on a lane-dense 2D array (last dim a multiple of 128)."""
    rows, lane = x2d.shape
    n = rows * lane
    total_bytes = n * itemsize

    if total_bytes <= _SMALL_BYTES:
        # Single whole-array block: no grid, no per-step overhead.
        return pl.pallas_call(
            _quartic_kernel,
            out_shape=jax.ShapeDtypeStruct((rows, lane), dtype),
            cost_estimate=_cost(n, itemsize),
        )(x2d)

    block_bytes = _pick_block_bytes()
    packing = max(1, 4 // itemsize)       # sub-32-bit dtypes pack along sublanes
    sub = 8 * packing                      # sublane-aligned row granularity
    block_rows = (block_bytes // (lane * itemsize)) // sub * sub
    block_rows = max(sub, block_rows)

    # Guarantee >= 2 grid steps so v7x's two TensorCores both get work
    # (harmless on single-TC chips).
    half_rows = pl.cdiv(pl.cdiv(rows, 2), sub) * sub
    block_rows = max(sub, min(block_rows, half_rows))

    grid = (pl.cdiv(rows, block_rows),)
    # in + out, double-buffered = 4 live blocks, plus headroom.
    vmem_limit = int(4 * block_rows * lane * itemsize + (8 << 20))

    return pl.pallas_call(
        _quartic_kernel,
        out_shape=jax.ShapeDtypeStruct((rows, lane), dtype),
        grid=grid,
        in_specs=[pl.BlockSpec((block_rows, lane), lambda i: (i, 0))],
        out_specs=pl.BlockSpec((block_rows, lane), lambda i: (i, 0)),
        compiler_params=pltpu.CompilerParams(
            dimension_semantics=("parallel",),
            vmem_limit_bytes=vmem_limit,
        ),
        cost_estimate=_cost(n, itemsize),
    )(x2d)


def quadratic_activation(x):
    """Elementwise x**4 via Pallas TPU kernels. Accepts any shape / float dtype."""
    orig_shape = x.shape
    dtype = x.dtype
    n = x.size
    if n == 0:
        return x

    itemsize = jnp.dtype(dtype).itemsize
    x_flat = jnp.ravel(x)

    n_main = (n // 128) * 128   # largest 128-multiple prefix
    tail = n - n_main           # < 128 leftover elements (rare)

    outs = []
    if n_main:
        # Widest lane-dense last dim (multiple of 128) dividing the main part:
        # wide unmasked vst beats narrow/masked stores.
        lane = 128
        for cand in (4096, 2048, 1024, 512, 256, 128):
            if n_main % cand == 0:
                lane = cand
                break
        main2d = x_flat[:n_main].reshape(n_main // lane, lane)
        outs.append(_quartic_2d(main2d, dtype, itemsize).reshape(-1))

    if tail:
        # Pad only the <128-element tail (never the whole array).
        tail_pad = jnp.pad(x_flat[n_main:], (0, 128 - tail)).reshape(1, 128)
        out_tail = pl.pallas_call(
            _quartic_kernel,
            out_shape=jax.ShapeDtypeStruct((1, 128), dtype),
            cost_estimate=_cost(128, itemsize),
        )(tail_pad)
        outs.append(out_tail.reshape(-1)[:tail])

    out_flat = outs[0] if len(outs) == 1 else jnp.concatenate(outs)
    return out_flat.reshape(orig_shape)


if __name__ == "__main__":
    key = jax.random.PRNGKey(0)
    x = jax.random.normal(key, (2, 4, 16, 16), dtype=jnp.float32)

    y = quadratic_activation(x)
    jax.block_until_ready(y)

    # Correctness check against pure-JAX reference.
    ref = x ** 4
    assert y.shape == x.shape and y.dtype == x.dtype
    assert jnp.allclose(y, ref, rtol=1e-6, atol=1e-6)

    print("KERNEL_OK")
</pallas_src>

<mosaic_0001>
module attributes {stable_mosaic.version = 11 : i64} {
  func.func @_quartic_kernel(%arg0: memref<1x2048xf32, #tpu.memory_space<vmem>>, %arg1: memref<1x2048xf32, #tpu.memory_space<vmem>>) attributes {dimension_semantics = [], scalar_prefetch = 0 : i64, scratch_operands = 0 : i64, tpu.core_type = #tpu.core_type<tc>} {
    %c0 = arith.constant 0 : index
    %c0_0 = arith.constant 0 : index
    %0 = vector.load %arg0[%c0, %c0_0] : memref<1x2048xf32, #tpu.memory_space<vmem>>, vector<1x2048xf32>
    %1 = arith.mulf %0, %0 : vector<1x2048xf32>
    %2 = arith.mulf %1, %1 : vector<1x2048xf32>
    %c0_1 = arith.constant 0 : index
    %c0_2 = arith.constant 0 : index
    %3 = vector.load %arg1[%c0_1, %c0_2] : memref<1x2048xf32, #tpu.memory_space<vmem>>, vector<1x2048xf32>
    tpu.vector_store %arg1[%c0_1, %c0_2], %2 {strides = array<i32>} : memref<1x2048xf32, #tpu.memory_space<vmem>>, vector<1x2048xf32>,
    return
  }
}

</mosaic_0001>

<bundles_post_ra>
// kernel: tpu_custom_call.1
= control target key start
LH: loop header
LB: loop body
LE: loop exit
PB: predicated region body
PF: predicated region fallthrough
CT: control target
= control target key end

     0   :  { %6 = vsyncpa [#allocation3], 0  ;;  %s130_s0 = inlined_call_operand.hbm [shape: f32[1,2048], index: 0, kind: input, shape index: {}]   ;;  %s131_s1 = inlined_call_operand.hbm [shape: f32[1,2048], index: 1, kind: output, shape index: {}]  }
   0x1   :  { %7 = vsyncpa [#allocation4], 0  ;;  %s94_s6 = smov [#allocation2]   ;;  %s46_s10 = scalar_lea.hbm %s130_s0, 256 }
   0x2   :  { %s14_s7 = sshll.u32 %s94_s6, 4  ;;  %p47_p0 = scmp.ne.s32.totalorder %s130_s0, %s46_s10  ;;  %s15_s7 = int_to_ptr.vmem [resolvable:$true] %s14_s7 }
   0x3   :  { %p50_p1 = scmp.lt.u32.totalorder %s46_s10, %s130_s0 }
   0x5   :  { %p52_p2 = pnand %p50_p1, %p47_p0 }
   0x7   :  { %55 = shalt.err (!%p52_p2)
}
   0x8   :  { %s56_s15 = scalar_lea.vmem %s15_s7, 256  ;;  %p61_p4 = scmp.lt.s32.totalorder %s15_s7, %s15_s7 }
   0x9   :  { %p57_p3 = scmp.ne.s32.totalorder %s15_s7, %s56_s15  ;;  %p62_p5 = scmp.lt.s32.totalorder %s56_s15, %s56_s15 }
   0xb   :  { %p63_p6 = por %p62_p5, %p61_p4 }
   0xd   :  { %p64_p7 = pnand %p63_p6, %p57_p3 }
   0xf   :  { %67 = shalt.err (!%p64_p7)
}
  0x10   :  { %17 = dma.hbm_to_vmem [thread:$0]  %s130_s0, 256, %s15_s7, [#allocation3]  }
  0x11   :  { %90 = dma.done.wait [#allocation3], 256  }
  0x12   :  { %91 = vsyncadd [#allocation3], 4294967040  ;;  %v21_v0 = vld [vmem:[#allocation2] sm:$0xff]  ;;  %v22_v1 = vld [vmem:[#allocation2 + $0x8] sm:$0xff]  ;;  %s95_s18 = smov [#allocation5]  }
  0x13   :  { %s35_s19 = sshll.u32 %s95_s18, 4  ;;  %v23_v2 = vmul.f32 %v21_v0, %v21_v0  ;;  %v24_v3 = vmul.f32 %v22_v1, %v22_v1  ;;  %s36_s19 = int_to_ptr.vmem [resolvable:$true] %s35_s19 }
  0x14   :  { %s68_s20 = scalar_lea.vmem %s36_s19, 256  ;;  %p73_p9 = scmp.lt.s32.totalorder %s36_s19, %s36_s19 }
  0x15   :  { %v25_v4 = vmul.f32 %v23_v2, %v23_v2  ;;  %v26_v5 = vmul.f32 %v24_v3, %v24_v3  ;;  %p69_p8 = scmp.ne.s32.totalorder %s36_s19, %s68_s20  ;;  %p74_p10 = scmp.lt.s32.totalorder %s68_s20, %s68_s20 }
  0x17   :  { %27 = vst [vmem:[#allocation5] sm:$0xff] %v25_v4  ;;  %28 = vst [vmem:[#allocation5 + $0x8] sm:$0xff] %v26_v5  ;;  %p75_p11 = por %p74_p10, %p73_p9 }
  0x19   :  { %p76_p12 = pnand %p75_p11, %p69_p8 }
  0x1b   :  { %79 = shalt.err (!%p76_p12)
}
  0x1c   :  { %s80_s22 = scalar_lea.hbm %s131_s1, 256 }
  0x1d   :  { %p81_p13 = scmp.ne.s32.totalorder %s131_s1, %s80_s22  ;;  %p84_p0 = scmp.lt.u32.totalorder %s80_s22, %s131_s1 }
  0x1f   :  { %p86_p1 = pnand %p84_p0, %p81_p13 }
  0x21   :  { %89 = shalt.err (!%p86_p1)
}
  0x22   :  { %38 = dma.vmem_to_hbm [thread:$0]  %s36_s19, 256, %s131_s1, [#allocation4]  }
  0x23   :  { %92 = dma.done.wait [#allocation4], 256  }
  0x24   :  { %93 = vsyncadd [#allocation4], 4294967040 }
  0x25   :  { %42 = vsyncpa [#allocation3], 1 }
  0x26   :  { %43 = vsyncpa [#allocation4], 1 }

</bundles_post_ra>
